<compile_context>
chip_gen: v6e
topology: v6e:2x2x1
jax: 0.10.0
libtpu: 0.0.40
codegen_flags: <defaults>
</compile_context>

<pallas_src>
import jax
import jax.numpy as jnp
from jax.experimental import pallas as pl
from jax.experimental.pallas import tpu as pltpu

LANE = 128
SUBLANE = 8


def _cdiv(a, b):
    return (a + b - 1) // b


def _round_up(x, m):
    return ((x + m - 1) // m) * m


def _pad2(a, rows, cols):
    return jnp.pad(a, ((0, rows - a.shape[0]), (0, cols - a.shape[1])))


# ---------------------------------------------------------------------------
# Fused MLP kernel: refs = (x_ref, w0, b0, w1, b1, ..., o_ref)
# ---------------------------------------------------------------------------
def _make_fused_mlp_kernel(n_layers):
    def kernel(*refs):
        x_ref = refs[0]
        o_ref = refs[-1]
        wb = refs[1:-1]

        h = x_ref[...]                                   # bf16 (tm, K0p)
        for li in range(n_layers):                       # unrolled at trace time
            w_ref = wb[2 * li]                           # bf16 (Kp, Fp), VMEM-resident
            b_ref = wb[2 * li + 1]                       # f32  (1, Fp)
            y = jnp.dot(h, w_ref[...],
                        preferred_element_type=jnp.float32)
            y = jnp.maximum(y + b_ref[...], 0.0)         # fused bias + ReLU (f32)
            if li + 1 < n_layers:
                h = y.astype(jnp.bfloat16)               # bf16 feeds next MXU matmul
            else:
                # Store only the real output columns (block last dim == full
                # array dim) -> HBM writeback is out_feats wide, not 128-padded.
                o_ref[...] = y[:, : o_ref.shape[-1]]
    return kernel


# ---------------------------------------------------------------------------
# One-time parameter preparation (hoisted padding + bf16 cast)
# ---------------------------------------------------------------------------
def prepare_params(params):
    """params: list of (w: (fin, fout) f32, b: (1, fout) f32); weights stored
    pre-transposed as (in, out) so no in-kernel transpose is needed."""
    operands, shapes = [], []
    for (w, b) in params:
        fin, fout = w.shape
        kp, fp = _round_up(fin, LANE), _round_up(fout, LANE)
        operands.append(_pad2(w, kp, fp).astype(jnp.bfloat16))
        operands.append(_pad2(b, 1, fp))                 # bias stays f32
        shapes.append((kp, fp))
    weight_bytes = sum(kp * fp * 2 + fp * 4 for (kp, fp) in shapes)
    return dict(
        operands=operands,
        shapes=shapes,
        in_feats=params[0][0].shape[0],
        out_feats=params[-1][0].shape[1],
        max_fp=max(fp for (_, fp) in shapes),
        weight_bytes=weight_bytes,
        n_layers=len(params),
    )


# ---------------------------------------------------------------------------
# pallas_call construction
# ---------------------------------------------------------------------------
_WEIGHT_SINGLE_BUFFER = True   # flipped off if this build rejects Buffered(1)


def _const_spec(shape, single_buffer):
    # Constant index_map => fetched once and kept resident; Buffered(1) avoids
    # allocating a useless second buffer for every resident weight/bias.
    if single_buffer:
        return pl.BlockSpec(shape, lambda i: (0, 0), pipeline_mode=pl.Buffered(1))
    return pl.BlockSpec(shape, lambda i: (0, 0))


def _vmem_limit_bytes(tm, k0, out_feats, max_fp, weight_bytes, single_buffer):
    x_bytes = 2 * tm * k0 * 2                 # double-buffered bf16 x tile
    o_bytes = 2 * tm * out_feats * 4          # double-buffered f32 out tile
    w_bytes = weight_bytes * (1 if single_buffer else 2)
    act_bytes = 3 * tm * max_fp * 4           # f32 activation temporaries
    total = x_bytes + o_bytes + w_bytes + act_bytes
    limit = int(1.5 * total) + (4 << 20)      # headroom
    # Floor gives the compiler slack; 48 MiB cap stays inside v7x's 64 MiB VMEM
    # (v5e/v6e have 128 MiB and never need more than this footprint here).
    return max(16 << 20, min(limit, 48 << 20))


def _run_fused(x_p, prepared, tm, n_blocks, single_buffer):
    k0 = x_p.shape[1]
    out_feats = prepared["out_feats"]

    in_specs = [pl.BlockSpec((tm, k0), lambda i: (i, 0))]
    for (kp, fp) in prepared["shapes"]:
        in_specs.append(_const_spec((kp, fp), single_buffer))   # whole weight, reused
        in_specs.append(_const_spec((1, fp), single_buffer))    # whole bias, reused

    return pl.pallas_call(
        _make_fused_mlp_kernel(prepared["n_layers"]),
        out_shape=jax.ShapeDtypeStruct((x_p.shape[0], out_feats), jnp.float32),
        grid_spec=pltpu.PrefetchScalarGridSpec(
            num_scalar_prefetch=0,
            grid=(n_blocks,),
            in_specs=in_specs,
            out_specs=pl.BlockSpec((tm, out_feats), lambda i: (i, 0)),
        ),
        compiler_params=pltpu.CompilerParams(
            dimension_semantics=("parallel",),   # megacore split over row tiles
            vmem_limit_bytes=_vmem_limit_bytes(
                tm, k0, out_feats, prepared["max_fp"],
                prepared["weight_bytes"], single_buffer),
        ),
    )(x_p, *prepared["operands"])


def mlp_forward(x, prepared, *, tm=512):
    global _WEIGHT_SINGLE_BUFFER
    N, in_feats = x.shape
    assert in_feats == prepared["in_feats"]

    # Row tile: large (>=512) to amortize per-step overhead; for N >= 256 keep
    # at least 2 tiles so both v7x TensorCores get work; always a multiple of 8.
    if N >= 256:
        tm = min(tm, _round_up(_cdiv(N, 2), SUBLANE))
    tm = max(SUBLANE, min(tm, _round_up(N, SUBLANE)))
    n_blocks = _cdiv(N, tm)
    n_pad = n_blocks * tm                      # pad N: every block full, no masked edge

    k0 = _round_up(in_feats, LANE)
    x_p = _pad2(x, n_pad, k0).astype(jnp.bfloat16)

    try:
        out = _run_fused(x_p, prepared, tm, n_blocks, _WEIGHT_SINGLE_BUFFER)
    except Exception:
        if not _WEIGHT_SINGLE_BUFFER:
            raise
        _WEIGHT_SINGLE_BUFFER = False          # Buffered(1) unsupported -> fall back
        out = _run_fused(x_p, prepared, tm, n_blocks, False)

    out = out[:N]                              # drop row padding
    if prepared["out_feats"] == 1:             # torch .squeeze(-1) semantics
        out = jnp.squeeze(out, axis=-1)
    return out


# ---------------------------------------------------------------------------
# Parameter init mimicking nn.Linear defaults (uniform +-1/sqrt(fan_in))
# ---------------------------------------------------------------------------
def init_mlp_params(key, in_feats, out_feats, n_layers):
    hidden = 2 * in_feats
    dims = []
    fi = in_feats
    for _ in range(n_layers - 1):
        dims.append((fi, hidden))
        fi = hidden
    dims.append((hidden, out_feats))

    params = []
    for fin, fout in dims:
        key, k_w, k_b = jax.random.split(key, 3)
        bound = 1.0 / float(jnp.sqrt(jnp.float32(fin)))
        w = jax.random.uniform(k_w, (fin, fout), jnp.float32, -bound, bound)
        b = jax.random.uniform(k_b, (1, fout), jnp.float32, -bound, bound)
        params.append((w, b))
    return params


# ---------------------------------------------------------------------------
# Pure-JAX references (ReLU after EVERY layer, incl. last — matches the module)
# ---------------------------------------------------------------------------
def mlp_reference(x, params, compute_dtype=jnp.bfloat16):
    h = x
    y = None
    for (w, b) in params:
        y = jnp.dot(h.astype(compute_dtype), w.astype(compute_dtype),
                    preferred_element_type=jnp.float32) + b
        y = jnp.maximum(y, 0.0)
        h = y
    if y.shape[-1] == 1:
        y = jnp.squeeze(y, axis=-1)
    return y


if __name__ == "__main__":
    # --- test 1: original toy shapes (8 nodes, 16 feats, 3 layers, out=1) ---
    N, IN_FEATS, OUT_FEATS, N_LAYERS = 8, 16, 1, 3
    key = jax.random.PRNGKey(0)
    key, kx = jax.random.split(key)
    x = jax.random.normal(kx, (N, IN_FEATS), jnp.float32)
    params = init_mlp_params(key, IN_FEATS, OUT_FEATS, N_LAYERS)
    prepared = prepare_params(params)          # padding/cast hoisted, done once

    out = jax.block_until_ready(mlp_forward(x, prepared))
    assert out.shape == (N,), out.shape
    ref_bf16 = mlp_reference(x, params, compute_dtype=jnp.bfloat16)
    ref_f32 = mlp_reference(x, params, compute_dtype=jnp.float32)
    assert jnp.allclose(out, ref_bf16, atol=2e-3, rtol=2e-3), "mismatch vs bf16 ref"
    assert jnp.allclose(out, ref_f32, atol=5e-2, rtol=5e-2), "mismatch vs f32 ref"

    # --- test 2: larger, non-aligned shapes (row padding + >=2-tile grid) ---
    N2, IN2, OUT2, NL2 = 1000, 96, 64, 2
    key2 = jax.random.PRNGKey(0)
    key2, kx2 = jax.random.split(key2)
    x2 = jax.random.normal(kx2, (N2, IN2), jnp.float32)
    params2 = init_mlp_params(key2, IN2, OUT2, NL2)
    prepared2 = prepare_params(params2)

    out2 = jax.block_until_ready(mlp_forward(x2, prepared2))
    assert out2.shape == (N2, OUT2), out2.shape
    ref2 = mlp_reference(x2, params2, compute_dtype=jnp.bfloat16)
    assert jnp.allclose(out2, ref2, atol=2e-3, rtol=2e-3), "mismatch vs bf16 ref (large)"

    print("KERNEL_OK")
</pallas_src>

<mosaic_0001>
module attributes {stable_mosaic.version = 11 : i64} {
  func.func @kernel(%arg0: i32, %arg1: memref<8x128xbf16, #tpu.memory_space<vmem>>, %arg2: memref<128x128xbf16, #tpu.memory_space<vmem>>, %arg3: memref<1x128xf32, #tpu.memory_space<vmem>>, %arg4: memref<128x128xbf16, #tpu.memory_space<vmem>>, %arg5: memref<1x128xf32, #tpu.memory_space<vmem>>, %arg6: memref<128x128xbf16, #tpu.memory_space<vmem>>, %arg7: memref<1x128xf32, #tpu.memory_space<vmem>>, %arg8: memref<8x1xf32, #tpu.memory_space<vmem>>) attributes {dimension_semantics = [#tpu.dimension_semantics<parallel>], iteration_bounds = array<i64: 1>, scalar_prefetch = 0 : i64, scratch_operands = 0 : i64, tpu.core_type = #tpu.core_type<tc>, window_params = [{transform_indices = @transform_0, window_bounds = array<i64: 8, 128>}, {pipeline_mode = #tpu.pipeline_mode<synchronous>, transform_indices = @transform_1, window_bounds = array<i64: 128, 128>}, {pipeline_mode = #tpu.pipeline_mode<synchronous>, transform_indices = @transform_2, window_bounds = array<i64: 1, 128>}, {pipeline_mode = #tpu.pipeline_mode<synchronous>, transform_indices = @transform_3, window_bounds = array<i64: 128, 128>}, {pipeline_mode = #tpu.pipeline_mode<synchronous>, transform_indices = @transform_4, window_bounds = array<i64: 1, 128>}, {pipeline_mode = #tpu.pipeline_mode<synchronous>, transform_indices = @transform_5, window_bounds = array<i64: 128, 128>}, {pipeline_mode = #tpu.pipeline_mode<synchronous>, transform_indices = @transform_6, window_bounds = array<i64: 1, 128>}, {transform_indices = @transform_7, window_bounds = array<i64: 8, 1>}]} {
    %c0 = arith.constant 0 : index
    %c0_0 = arith.constant 0 : index
    %0 = vector.load %arg1[%c0, %c0_0] : memref<8x128xbf16, #tpu.memory_space<vmem>>, vector<8x128xbf16>
    %c0_1 = arith.constant 0 : index
    %c0_2 = arith.constant 0 : index
    %1 = vector.load %arg2[%c0_1, %c0_2] : memref<128x128xbf16, #tpu.memory_space<vmem>>, vector<128x128xbf16>
    %cst = arith.constant dense<0.000000e+00> : vector<8x128xf32>
    %2 = tpu.matmul %0, %1, %cst {dimension_numbers = #tpu.dot_dimension_numbers<[1], [0], [0], [1], [0, 0, 1, 1], [], []>} : vector<8x128xbf16>, vector<128x128xbf16>, vector<8x128xf32> -> vector<8x128xf32>
    %c0_3 = arith.constant 0 : index
    %c0_4 = arith.constant 0 : index
    %3 = vector.load %arg3[%c0_3, %c0_4] : memref<1x128xf32, #tpu.memory_space<vmem>>, vector<1x128xf32>
    %4 = vector.broadcast %3 : vector<1x128xf32> to vector<8x128xf32>
    %5 = arith.addf %2, %4 : vector<8x128xf32>
    %cst_5 = arith.constant 0.000000e+00 : f32
    %6 = vector.broadcast %cst_5 : f32 to vector<8x128xf32>
    %7 = arith.maximumf %5, %6 : vector<8x128xf32>
    %8 = arith.truncf %7 : vector<8x128xf32> to vector<8x128xbf16>
    %c0_6 = arith.constant 0 : index
    %c0_7 = arith.constant 0 : index
    %9 = vector.load %arg4[%c0_6, %c0_7] : memref<128x128xbf16, #tpu.memory_space<vmem>>, vector<128x128xbf16>
    %cst_8 = arith.constant dense<0.000000e+00> : vector<8x128xf32>
    %10 = tpu.matmul %8, %9, %cst_8 {dimension_numbers = #tpu.dot_dimension_numbers<[1], [0], [0], [1], [0, 0, 1, 1], [], []>} : vector<8x128xbf16>, vector<128x128xbf16>, vector<8x128xf32> -> vector<8x128xf32>
    %c0_9 = arith.constant 0 : index
    %c0_10 = arith.constant 0 : index
    %11 = vector.load %arg5[%c0_9, %c0_10] : memref<1x128xf32, #tpu.memory_space<vmem>>, vector<1x128xf32>
    %12 = vector.broadcast %11 : vector<1x128xf32> to vector<8x128xf32>
    %13 = arith.addf %10, %12 : vector<8x128xf32>
    %cst_11 = arith.constant 0.000000e+00 : f32
    %14 = vector.broadcast %cst_11 : f32 to vector<8x128xf32>
    %15 = arith.maximumf %13, %14 : vector<8x128xf32>
    %16 = arith.truncf %15 : vector<8x128xf32> to vector<8x128xbf16>
    %c0_12 = arith.constant 0 : index
    %c0_13 = arith.constant 0 : index
    %17 = vector.load %arg6[%c0_12, %c0_13] : memref<128x128xbf16, #tpu.memory_space<vmem>>, vector<128x128xbf16>
    %cst_14 = arith.constant dense<0.000000e+00> : vector<8x128xf32>
    %18 = tpu.matmul %16, %17, %cst_14 {dimension_numbers = #tpu.dot_dimension_numbers<[1], [0], [0], [1], [0, 0, 1, 1], [], []>} : vector<8x128xbf16>, vector<128x128xbf16>, vector<8x128xf32> -> vector<8x128xf32>
    %c0_15 = arith.constant 0 : index
    %c0_16 = arith.constant 0 : index
    %19 = vector.load %arg7[%c0_15, %c0_16] : memref<1x128xf32, #tpu.memory_space<vmem>>, vector<1x128xf32>
    %20 = vector.broadcast %19 : vector<1x128xf32> to vector<8x128xf32>
    %21 = arith.addf %18, %20 : vector<8x128xf32>
    %cst_17 = arith.constant 0.000000e+00 : f32
    %22 = vector.broadcast %cst_17 : f32 to vector<8x128xf32>
    %23 = arith.maximumf %21, %22 : vector<8x128xf32>
    %24 = vector.extract_strided_slice %23 {offsets = [0, 0], sizes = [8, 1], strides = [1, 1]} : vector<8x128xf32> to vector<8x1xf32>
    %c0_18 = arith.constant 0 : index
    %c0_19 = arith.constant 0 : index
    %25 = vector.load %arg8[%c0_18, %c0_19] : memref<8x1xf32, #tpu.memory_space<vmem>>, vector<8x1xf32>
    tpu.vector_store %arg8[%c0_18, %c0_19], %24 {strides = array<i32>} : memref<8x1xf32, #tpu.memory_space<vmem>>, vector<8x1xf32>,
    return
  }
  func.func @transform_0(%arg0: i32) -> (i32, i32) {
    %c0_i32 = arith.constant 0 : i32
    %c0_i32_0 = arith.constant 0 : i32
    return %arg0, %c0_i32 : i32, i32
  }
  func.func @transform_1(%arg0: i32) -> (i32, i32) {
    %c0_i32 = arith.constant 0 : i32
    %c0_i32_0 = arith.constant 0 : i32
    %c0_i32_1 = arith.constant 0 : i32
    return %c0_i32, %c0_i32_0 : i32, i32
  }
  func.func @transform_2(%arg0: i32) -> (i32, i32) {
    %c0_i32 = arith.constant 0 : i32
    %c0_i32_0 = arith.constant 0 : i32
    %c0_i32_1 = arith.constant 0 : i32
    return %c0_i32, %c0_i32_0 : i32, i32
  }
  func.func @transform_3(%arg0: i32) -> (i32, i32) {
    %c0_i32 = arith.constant 0 : i32
    %c0_i32_0 = arith.constant 0 : i32
    %c0_i32_1 = arith.constant 0 : i32
    return %c0_i32, %c0_i32_0 : i32, i32
  }
  func.func @transform_4(%arg0: i32) -> (i32, i32) {
    %c0_i32 = arith.constant 0 : i32
    %c0_i32_0 = arith.constant 0 : i32
    %c0_i32_1 = arith.constant 0 : i32
    return %c0_i32, %c0_i32_0 : i32, i32
  }
  func.func @transform_5(%arg0: i32) -> (i32, i32) {
    %c0_i32 = arith.constant 0 : i32
    %c0_i32_0 = arith.constant 0 : i32
    %c0_i32_1 = arith.constant 0 : i32
    return %c0_i32, %c0_i32_0 : i32, i32
  }
  func.func @transform_6(%arg0: i32) -> (i32, i32) {
    %c0_i32 = arith.constant 0 : i32
    %c0_i32_0 = arith.constant 0 : i32
    %c0_i32_1 = arith.constant 0 : i32
    return %c0_i32, %c0_i32_0 : i32, i32
  }
  func.func @transform_7(%arg0: i32) -> (i32, i32) {
    %c0_i32 = arith.constant 0 : i32
    %c0_i32_0 = arith.constant 0 : i32
    return %arg0, %c0_i32 : i32, i32
  }
}

module attributes {stable_mosaic.version = 11 : i64} {
  func.func @kernel(%arg0: i32, %arg1: memref<8x128xbf16, #tpu.memory_space<vmem>>, %arg2: memref<128x128xbf16, #tpu.memory_space<vmem>>, %arg3: memref<1x128xf32, #tpu.memory_space<vmem>>, %arg4: memref<128x128xbf16, #tpu.memory_space<vmem>>, %arg5: memref<1x128xf32, #tpu.memory_space<vmem>>, %arg6: memref<128x128xbf16, #tpu.memory_space<vmem>>, %arg7: memref<1x128xf32, #tpu.memory_space<vmem>>, %arg8: memref<8x1xf32, #tpu.memory_space<vmem>>) attributes {dimension_semantics = [#tpu.dimension_semantics<parallel>], iteration_bounds = array<i64: 1>, scalar_prefetch = 0 : i64, scratch_operands = 0 : i64, tpu.core_type = #tpu.core_type<tc>, window_params = [{transform_indices = @transform_0, window_bounds = array<i64: 8, 128>}, {pipeline_mode = #tpu.pipeline_mode<synchronous>, transform_indices = @transform_1, window_bounds = array<i64: 128, 128>}, {pipeline_mode = #tpu.pipeline_mode<synchronous>, transform_indices = @transform_2, window_bounds = array<i64: 1, 128>}, {pipeline_mode = #tpu.pipeline_mode<synchronous>, transform_indices = @transform_3, window_bounds = array<i64: 128, 128>}, {pipeline_mode = #tpu.pipeline_mode<synchronous>, transform_indices = @transform_4, window_bounds = array<i64: 1, 128>}, {pipeline_mode = #tpu.pipeline_mode<synchronous>, transform_indices = @transform_5, window_bounds = array<i64: 128, 128>}, {pipeline_mode = #tpu.pipeline_mode<synchronous>, transform_indices = @transform_6, window_bounds = array<i64: 1, 128>}, {transform_indices = @transform_7, window_bounds = array<i64: 8, 1>}]} {
    %c0 = arith.constant 0 : index
    %c0_0 = arith.constant 0 : index
    %0 = vector.load %arg1[%c0, %c0_0] : memref<8x128xbf16, #tpu.memory_space<vmem>>, vector<8x128xbf16>
    %c0_1 = arith.constant 0 : index
    %c0_2 = arith.constant 0 : index
    %1 = vector.load %arg2[%c0_1, %c0_2] : memref<128x128xbf16, #tpu.memory_space<vmem>>, vector<128x128xbf16>
    %cst = arith.constant dense<0.000000e+00> : vector<8x128xf32>
    %2 = tpu.matmul %0, %1, %cst {dimension_numbers = #tpu.dot_dimension_numbers<[1], [0], [0], [1], [0, 0, 1, 1], [], []>} : vector<8x128xbf16>, vector<128x128xbf16>, vector<8x128xf32> -> vector<8x128xf32>
    %c0_3 = arith.constant 0 : index
    %c0_4 = arith.constant 0 : index
    %3 = vector.load %arg3[%c0_3, %c0_4] : memref<1x128xf32, #tpu.memory_space<vmem>>, vector<1x128xf32>
    %4 = vector.broadcast %3 : vector<1x128xf32> to vector<8x128xf32>
    %5 = arith.addf %2, %4 : vector<8x128xf32>
    %cst_5 = arith.constant 0.000000e+00 : f32
    %6 = vector.broadcast %cst_5 : f32 to vector<8x128xf32>
    %7 = arith.maximumf %5, %6 : vector<8x128xf32>
    %8 = arith.truncf %7 : vector<8x128xf32> to vector<8x128xbf16>
    %c0_6 = arith.constant 0 : index
    %c0_7 = arith.constant 0 : index
    %9 = vector.load %arg4[%c0_6, %c0_7] : memref<128x128xbf16, #tpu.memory_space<vmem>>, vector<128x128xbf16>
    %cst_8 = arith.constant dense<0.000000e+00> : vector<8x128xf32>
    %10 = tpu.matmul %8, %9, %cst_8 {dimension_numbers = #tpu.dot_dimension_numbers<[1], [0], [0], [1], [0, 0, 1, 1], [], []>} : vector<8x128xbf16>, vector<128x128xbf16>, vector<8x128xf32> -> vector<8x128xf32>
    %c0_9 = arith.constant 0 : index
    %c0_10 = arith.constant 0 : index
    %11 = vector.load %arg5[%c0_9, %c0_10] : memref<1x128xf32, #tpu.memory_space<vmem>>, vector<1x128xf32>
    %12 = vector.broadcast %11 : vector<1x128xf32> to vector<8x128xf32>
    %13 = arith.addf %10, %12 : vector<8x128xf32>
    %cst_11 = arith.constant 0.000000e+00 : f32
    %14 = vector.broadcast %cst_11 : f32 to vector<8x128xf32>
    %15 = arith.maximumf %13, %14 : vector<8x128xf32>
    %16 = arith.truncf %15 : vector<8x128xf32> to vector<8x128xbf16>
    %c0_12 = arith.constant 0 : index
    %c0_13 = arith.constant 0 : index
    %17 = vector.load %arg6[%c0_12, %c0_13] : memref<128x128xbf16, #tpu.memory_space<vmem>>, vector<128x128xbf16>
    %cst_14 = arith.constant dense<0.000000e+00> : vector<8x128xf32>
    %18 = tpu.matmul %16, %17, %cst_14 {dimension_numbers = #tpu.dot_dimension_numbers<[1], [0], [0], [1], [0, 0, 1, 1], [], []>} : vector<8x128xbf16>, vector<128x128xbf16>, vector<8x128xf32> -> vector<8x128xf32>
    %c0_15 = arith.constant 0 : index
    %c0_16 = arith.constant 0 : index
    %19 = vector.load %arg7[%c0_15, %c0_16] : memref<1x128xf32, #tpu.memory_space<vmem>>, vector<1x128xf32>
    %20 = vector.broadcast %19 : vector<1x128xf32> to vector<8x128xf32>
    %21 = arith.addf %18, %20 : vector<8x128xf32>
    %cst_17 = arith.constant 0.000000e+00 : f32
    %22 = vector.broadcast %cst_17 : f32 to vector<8x128xf32>
    %23 = arith.maximumf %21, %22 : vector<8x128xf32>
    %24 = vector.extract_strided_slice %23 {offsets = [0, 0], sizes = [8, 1], strides = [1, 1]} : vector<8x128xf32> to vector<8x1xf32>
    %c0_18 = arith.constant 0 : index
    %c0_19 = arith.constant 0 : index
    %25 = vector.load %arg8[%c0_18, %c0_19] : memref<8x1xf32, #tpu.memory_space<vmem>>, vector<8x1xf32>
    tpu.vector_store %arg8[%c0_18, %c0_19], %24 {strides = array<i32>} : memref<8x1xf32, #tpu.memory_space<vmem>>, vector<8x1xf32>,
    return
  }
  func.func @transform_0(%arg0: i32) -> (i32, i32) {
    %c0_i32 = arith.constant 0 : i32
    %c0_i32_0 = arith.constant 0 : i32
    return %arg0, %c0_i32 : i32, i32
  }
  func.func @transform_1(%arg0: i32) -> (i32, i32) {
    %c0_i32 = arith.constant 0 : i32
    %c0_i32_0 = arith.constant 0 : i32
    %c0_i32_1 = arith.constant 0 : i32
    return %c0_i32, %c0_i32_0 : i32, i32
  }
  func.func @transform_2(%arg0: i32) -> (i32, i32) {
    %c0_i32 = arith.constant 0 : i32
    %c0_i32_0 = arith.constant 0 : i32
    %c0_i32_1 = arith.constant 0 : i32
    return %c0_i32, %c0_i32_0 : i32, i32
  }
  func.func @transform_3(%arg0: i32) -> (i32, i32) {
    %c0_i32 = arith.constant 0 : i32
    %c0_i32_0 = arith.constant 0 : i32
    %c0_i32_1 = arith.constant 0 : i32
    return %c0_i32, %c0_i32_0 : i32, i32
  }
  func.func @transform_4(%arg0: i32) -> (i32, i32) {
    %c0_i32 = arith.constant 0 : i32
    %c0_i32_0 = arith.constant 0 : i32
    %c0_i32_1 = arith.constant 0 : i32
    return %c0_i32, %c0_i32_0 : i32, i32
  }
  func.func @transform_5(%arg0: i32) -> (i32, i32) {
    %c0_i32 = arith.constant 0 : i32
    %c0_i32_0 = arith.constant 0 : i32
    %c0_i32_1 = arith.constant 0 : i32
    return %c0_i32, %c0_i32_0 : i32, i32
  }
  func.func @transform_6(%arg0: i32) -> (i32, i32) {
    %c0_i32 = arith.constant 0 : i32
    %c0_i32_0 = arith.constant 0 : i32
    %c0_i32_1 = arith.constant 0 : i32
    return %c0_i32, %c0_i32_0 : i32, i32
  }
  func.func @transform_7(%arg0: i32) -> (i32, i32) {
    %c0_i32 = arith.constant 0 : i32
    %c0_i32_0 = arith.constant 0 : i32
    return %arg0, %c0_i32 : i32, i32
  }
}

</mosaic_0001>

<bundles_post_ra>
// kernel: tpu_custom_call.1
= control target key start
LH: loop header
LB: loop body
LE: loop exit
PB: predicated region body
PF: predicated region fallthrough
CT: control target
= control target key end

     0   :  { %12 = vsyncpa [#allocation3], 0  ;;  %s771_s0 = inlined_call_operand.hbm [shape: bf16[8,128], index: 0, kind: input, shape index: {}]   ;;  %s772_s1 = inlined_call_operand.hbm [shape: bf16[128,128], index: 1, kind: input, shape index: {}]   ;;  %s773_s2 = inlined_call_operand.vmem [shape: f32[1,128], index: 2, kind: input, shape index: {}]   ;;  %s774_s3 = inlined_call_operand.hbm [shape: bf16[128,128], index: 3, kind: input, shape index: {}]   ;;  %s775_s4 = inlined_call_operand.vmem [shape: f32[1,128], index: 4, kind: input, shape index: {}]   ;;  %s776_s5 = inlined_call_operand.hbm [shape: bf16[128,128], index: 5, kind: input, shape index: {}]   ;;  %s777_s6 = inlined_call_operand.vmem [shape: f32[1,128], index: 6, kind: input, shape index: {}]   ;;  %s778_s7 = inlined_call_operand.vmem [shape: f32[8,1], index: 7, kind: output, shape index: {}]  }
   0x1   :  { %13 = vsyncpa [#allocation5], 0 }
   0x2   :  { %14 = vsyncpa [#allocation8], 0  ;;  %s660_s24 = smov [#allocation4]  }
   0x3   :  { %s30_s25 = sshll.u32 %s660_s24, 4  ;;  %s31_s25 = int_to_ptr.vmem [resolvable:$true] %s30_s25 }
   0x4   :  { %s582_s26 = scalar_lea.vmem %s31_s25, 1024  ;;  %p587_p1 = scmp.lt.s32.totalorder %s31_s25, %s31_s25 }
   0x5   :  { %p583_p0 = scmp.ne.s32.totalorder %s31_s25, %s582_s26  ;;  %p588_p2 = scmp.lt.s32.totalorder %s582_s26, %s582_s26 }
   0x7   :  { %p589_p3 = por %p588_p2, %p587_p1 }
   0x9   :  { %p590_p4 = pnand %p589_p3, %p583_p0 }
   0xb   :  { %593 = shalt.err (!%p590_p4)
}
   0xc   :  { %s661_s27 = smov 64   ;;  %s662_s28 = smov 4  }
   0xd   :  { %36 = dma.hbm_to_vmem [thread:$0]  %s772_s1, 1024, %s31_s25, [#allocation5], %s661_s27, %s661_s27, %s662_s28  }
   0xe   :  { %s663_s8 = smov [#allocation2]   ;;  %s664_s10 = smov [#allocation6]  }
   0xf   :  { %s21_s9 = sshll.u32 %s663_s8, 4  ;;  %s44_s11 = sshll.u32 %s664_s10, 4  ;;  %s22_s9 = int_to_ptr.vmem [resolvable:$true] %s21_s9  ;;  %s45_s11 = int_to_ptr.vmem [resolvable:$true] %s44_s11 }
  0x10   :  { %s602_s12 = scalar_lea.vmem %s22_s9, 64  ;;  %p607_p6 = scmp.lt.s32.totalorder %s22_s9, %s22_s9 }
  0x11   :  { %p603_p5 = scmp.ne.s32.totalorder %s22_s9, %s602_s12  ;;  %p608_p7 = scmp.lt.s32.totalorder %s602_s12, %s602_s12 }
  0x13   :  { %p609_p8 = por %p608_p7, %p607_p6 }
  0x15   :  { %p610_p9 = pnand %p609_p8, %p603_p5 }
  0x17   :  { %613 = shalt.err (!%p610_p9)
}
  0x18   :  { %24 = dma.hbm_to_vmem [thread:$0]  %s771_s0, 64, %s22_s9, [#allocation3]  }
  0x19   :  { %s622_s15 = scalar_lea.vmem %s45_s11, 1024  ;;  %p627_p11 = scmp.lt.s32.totalorder %s45_s11, %s45_s11 }
  0x1a   :  { %p623_p10 = scmp.ne.s32.totalorder %s45_s11, %s622_s15  ;;  %p628_p12 = scmp.lt.s32.totalorder %s622_s15, %s622_s15 }
  0x1c   :  { %p629_p13 = por %p628_p12, %p627_p11 }
  0x1e   :  { %p630_p0 = pnand %p629_p13, %p623_p10 }
  0x20   :  { %633 = shalt.err (!%p630_p0)
}
  0x21   :  { %50 = dma.hbm_to_vmem [thread:$0]  %s774_s3, 1024, %s45_s11, [#allocation5], %s661_s27, %s661_s27, %s662_s28  }
  0x22   :  { %s665_s17 = smov [#allocation7]  }
  0x23   :  { %s58_s18 = sshll.u32 %s665_s17, 4  ;;  %s59_s18 = int_to_ptr.vmem [resolvable:$true] %s58_s18 }
  0x24   :  { %s642_s19 = scalar_lea.vmem %s59_s18, 1024  ;;  %p647_p2 = scmp.lt.s32.totalorder %s59_s18, %s59_s18 }
  0x25   :  { %p643_p1 = scmp.ne.s32.totalorder %s59_s18, %s642_s19  ;;  %p648_p3 = scmp.lt.s32.totalorder %s642_s19, %s642_s19 }
  0x27   :  { %p649_p4 = por %p648_p3, %p647_p2 }
  0x29   :  { %p650_p5 = pnand %p649_p4, %p643_p1 }
  0x2b   :  { %653 = shalt.err (!%p650_p5)
}
  0x2c   :  { %64 = dma.hbm_to_vmem [thread:$0]  %s776_s5, 1024, %s59_s18, [#allocation8], %s661_s27, %s661_s27, %s662_s28  }
  0x2d   :  { %654 = dma.done.wait [#allocation3], 64  }
  0x2e   :  { %655 = vsyncadd [#allocation3], 4294967232 }
  0x2f   :  { %656 = dma.done.wait [#allocation5], 2048  }
  0x30   :  { %657 = vsyncadd [#allocation5], 4294965248 }
  0x31   :  { %658 = dma.done.wait [#allocation8], 1024  }
  0x32   :  { %659 = vsyncadd [#allocation8], 4294966272  ;;  %v666_v0 = vmov 0.0   ;;  %vm667_vm0 = vmmov 0   ;;  %v550_v1 = vld [vmem:[#allocation4 + $0x38] sm:$0xff]   ;;  %v551_v2 = vld [vmem:[#allocation4 + $0x30] sm:$0xff]  }
  0x33   :  { %482 = vmatprep.subr.bf16.mxu0 %v666_v0  ;;  %498 = vmatprep.mubr.msk.bf16.mxu0 %vm667_vm0, %v666_v0  ;;  %v552_v3 = vld [vmem:[#allocation4 + $0x28] sm:$0xff]   ;;  %v558_v4 = vld [vmem:[#allocation6 + $0x38] sm:$0xff]   ;;  %v553_v5 = vld [vmem:[#allocation4 + $0x20] sm:$0xff]   ;;  %vm419_vm1 = vcmask 7168  }
  0x34   :  { %502 = vmatprep.subr.bf16.mxu1 %v666_v0  ;;  %518 = vmatprep.mubr.msk.bf16.mxu1 %vm667_vm0, %v666_v0  ;;  %v559_v6 = vld [vmem:[#allocation6 + $0x30] sm:$0xff]   ;;  %v554_v7 = vld [vmem:[#allocation4 + $0x18] sm:$0xff]   ;;  %v560_v8 = vld [vmem:[#allocation6 + $0x28] sm:$0xff]  }
  0x35   :  { %483 = vmatpush3.bf16.msra.mxu0 %v550_v1  ;;  %503 = vmatpush3.bf16.msra.mxu1 %v558_v4  ;;  %v555_v9 = vld [vmem:[#allocation4 + $0x10] sm:$0xff]   ;;  %v561_v10 = vld [vmem:[#allocation6 + $0x20] sm:$0xff]   ;;  %v556_v11 = vld [vmem:[#allocation4 + $0x8] sm:$0xff]  }
  0x36   :  { %484 = vmatprep.subr.bf16.mxu0 %v666_v0  ;;  %504 = vmatprep.subr.bf16.mxu1 %v666_v0  ;;  %v562_v12 = vld [vmem:[#allocation6 + $0x18] sm:$0xff]   ;;  %v557_v13 = vld [vmem:[#allocation4] sm:$0xff]   ;;  %v563_v14 = vld [vmem:[#allocation6 + $0x10] sm:$0xff]  }
  0x37   :  { %v80_v15 = vld [vmem:[#allocation2] sm:$0xf]  ;;  %v564_v16 = vld [vmem:[#allocation6 + $0x8] sm:$0xff]   ;;  %v565_v17 = vld [vmem:[#allocation6] sm:$0xff]  }
  0x38   :  { %v566_v18 = vld [vmem:[#allocation7 + $0x38] sm:$0xff]   ;;  %v567_v19 = vld [vmem:[#allocation7 + $0x30] sm:$0xff]   ;;  %v568_v20 = vld [vmem:[#allocation7 + $0x28] sm:$0xff]  }
  0x39   :  { %485 = vmatpush3.bf16.msra.mxu0 %v551_v2  ;;  %505 = vmatpush3.bf16.msra.mxu1 %v559_v6  ;;  %v569_v21 = vld [vmem:[#allocation7 + $0x20] sm:$0xff]   ;;  %v570_v22 = vld [vmem:[#allocation7 + $0x18] sm:$0xff]   ;;  %v571_v23 = vld [vmem:[#allocation7 + $0x10] sm:$0xff]  }
  0x3a   :  { %486 = vmatprep.subr.bf16.mxu0 %v666_v0  ;;  %506 = vmatprep.subr.bf16.mxu1 %v666_v0  ;;  %v428_v24 = vld [vmem:[%s773_s2] ss:$0 sm:$0xff]  ;;  %v572_v32 = vld [vmem:[#allocation7 + $0x8] sm:$0xff]   ;;  %v573_v33 = vld [vmem:[#allocation7] sm:$0xff]  }
  0x3b   :  { %v437_v34 = vld [vmem:[%s775_s4] ss:$0 sm:$0xff] }
  0x3c   :  { %v446_v42 = vld [vmem:[%s777_s6] ss:$0 sm:$0xff] }
  0x3d   :  { %487 = vmatpush3.bf16.msra.mxu0 %v552_v3  ;;  %507 = vmatpush3.bf16.msra.mxu1 %v560_v8 }
  0x3e   :  { %488 = vmatprep.subr.bf16.mxu0 %v666_v0  ;;  %508 = vmatprep.subr.bf16.mxu1 %v666_v0 }
  0x41   :  { %489 = vmatpush3.bf16.msra.mxu0 %v553_v5  ;;  %509 = vmatpush3.bf16.msra.mxu1 %v561_v10 }
  0x42   :  { %490 = vmatprep.subr.bf16.mxu0 %v666_v0  ;;  %510 = vmatprep.subr.bf16.mxu1 %v666_v0 }
  0x45   :  { %491 = vmatpush3.bf16.msra.mxu0 %v554_v7  ;;  %511 = vmatpush3.bf16.msra.mxu1 %v562_v12 }
  0x46   :  { %492 = vmatprep.subr.bf16.mxu0 %v666_v0  ;;  %512 = vmatprep.subr.bf16.mxu1 %v666_v0 }
  0x49   :  { %493 = vmatpush3.bf16.msra.mxu0 %v555_v9  ;;  %513 = vmatpush3.bf16.msra.mxu1 %v563_v14 }
  0x4a   :  { %494 = vmatprep.subr.bf16.mxu0 %v666_v0  ;;  %514 = vmatprep.subr.bf16.mxu1 %v666_v0 }
  0x4d   :  { %495 = vmatpush3.bf16.msra.mxu0 %v556_v11  ;;  %515 = vmatpush3.bf16.msra.mxu1 %v564_v16 }
  0x4e   :  { %496 = vmatprep.subr.bf16.mxu0 %v666_v0  ;;  %516 = vmatprep.subr.bf16.mxu1 %v666_v0 }
  0x51   :  { %497 = vmatpush3.bf16.msra.mxu0 %v557_v13  ;;  %517 = vmatpush3.bf16.msra.mxu1 %v565_v17 }
  0x52   :  { %522 = vmatprep.subr.bf16.mxu0 %v666_v0 }
  0x54   :  { %499 = vmatmul.mubr.bf16.vlgmr.msra.gmra.mxu0 %v80_v15 }
  0x55   :  { %538 = vmatprep.mubr.msk.bf16.mxu0 %vm667_vm0, %v666_v0  ;;  %523 = vmatpush3.bf16.msra.mxu0 %v566_v18 }
  0x56   :  { %524 = vmatprep.subr.bf16.mxu0 %v666_v0 }
  0x59   :  { %525 = vmatpush3.bf16.msra.mxu0 %v567_v19 }
  0x5a   :  { %526 = vmatprep.subr.bf16.mxu0 %v666_v0 }
  0x5d   :  { %527 = vmatpush3.bf16.msra.mxu0 %v568_v20 }
  0x5e   :  { %528 = vmatprep.subr.bf16.mxu0 %v666_v0 }
  0x61   :  { %529 = vmatpush3.bf16.msra.mxu0 %v569_v21 }
  0x62   :  { %530 = vmatprep.subr.bf16.mxu0 %v666_v0 }
  0x65   :  { %531 = vmatpush3.bf16.msra.mxu0 %v570_v22 }
  0x66   :  { %532 = vmatprep.subr.bf16.mxu0 %v666_v0 }
  0x69   :  { %533 = vmatpush3.bf16.msra.mxu0 %v571_v23 }
  0x6a   :  { %534 = vmatprep.subr.bf16.mxu0 %v666_v0 }
  0x6d   :  { %535 = vmatpush3.bf16.msra.mxu0 %v572_v32 }
  0x6e   :  { %536 = vmatprep.subr.bf16.mxu0 %v666_v0 }
  0x71   :  { %537 = vmatpush3.bf16.msra.mxu0 %v573_v33 }
 0x114   :  { %v186_v25 = vpop.f32.mrf.mxu0 }
 0x115   :  { %v187_v26 = vadd.f32 %v428_v24, %v186_v25 }
 0x116   :  { %v500_v27 = vpop.f32.mrf.mxu0 }
 0x117   :  { %v192_v28 = vmax.f32 %v187_v26, 0.0 }
 0x118   :  { %v189_v29 = vpop.f32.mrf.mxu0 }
 0x119   :  { %v193_v30 = vpack.c.bf16 %v192_v28, %v192_v28 }
 0x11a   :  { %v501_v31 = vpop.f32.mrf.mxu0 }
 0x11b   :  { %519 = vmatmul.mubr.bf16.vlgmr.msra.gmra.mxu1 %v193_v30 }
 0x1db   :  { %v299_v35 = vpop.f32.mrf.mxu1 }
 0x1dc   :  { %v300_v36 = vadd.f32 %v437_v34, %v299_v35 }
 0x1dd   :  { %v520_v37 = vpop.f32.mrf.mxu1 }
 0x1de   :  { %v305_v38 = vmax.f32 %v300_v36, 0.0 }
 0x1df   :  { %v302_v39 = vpop.f32.mrf.mxu1 }
 0x1e0   :  { %v306_v40 = vpack.c.bf16 %v305_v38, %v305_v38 }
 0x1e1   :  { %v521_v41 = vpop.f32.mrf.mxu1 }
 0x1e2   :  { %539 = vmatmul.mubr.bf16.vlgmr.msra.gmra.mxu0 %v306_v40 }
 0x2a2   :  { %v412_v43 = vpop.f32.mrf.mxu0 }
 0x2a3   :  { %v413_v44 = vadd.f32 %v446_v42, %v412_v43 }
 0x2a4   :  { %v540_v45 = vpop.f32.mrf.mxu0 }
 0x2a5   :  { %v418_v46 = vmax.f32 %v413_v44, 0.0 }
 0x2a6   :  { %v415_v47 = vpop.f32.mrf.mxu0 }
 0x2a7   :  { %420 = vst.msk [vmem:[%s778_s7] sm:$0xff] %vm419_vm1, %v418_v46 }
 0x2a8   :  { %v541_v48 = vpop.f32.mrf.mxu0 }
 0x2a9   :  { %425 = vsyncpa [#allocation3], 1 }
 0x2aa   :  { %426 = vsyncpa [#allocation5], 1 }
 0x2ab   :  { %427 = vsyncpa [#allocation8], 1 }

// kernel: tpu_custom_call.1
= control target key start
LH: loop header
LB: loop body
LE: loop exit
PB: predicated region body
PF: predicated region fallthrough
CT: control target
= control target key end

     0   :  { %12 = vsyncpa [#allocation3], 0  ;;  %s771_s0 = inlined_call_operand.hbm [shape: bf16[8,128], index: 0, kind: input, shape index: {}]   ;;  %s772_s1 = inlined_call_operand.hbm [shape: bf16[128,128], index: 1, kind: input, shape index: {}]   ;;  %s773_s2 = inlined_call_operand.vmem [shape: f32[1,128], index: 2, kind: input, shape index: {}]   ;;  %s774_s3 = inlined_call_operand.hbm [shape: bf16[128,128], index: 3, kind: input, shape index: {}]   ;;  %s775_s4 = inlined_call_operand.vmem [shape: f32[1,128], index: 4, kind: input, shape index: {}]   ;;  %s776_s5 = inlined_call_operand.hbm [shape: bf16[128,128], index: 5, kind: input, shape index: {}]   ;;  %s777_s6 = inlined_call_operand.vmem [shape: f32[1,128], index: 6, kind: input, shape index: {}]   ;;  %s778_s7 = inlined_call_operand.vmem [shape: f32[8,1], index: 7, kind: output, shape index: {}]  }
   0x1   :  { %13 = vsyncpa [#allocation5], 0 }
   0x2   :  { %14 = vsyncpa [#allocation8], 0  ;;  %s660_s24 = smov [#allocation4]  }
   0x3   :  { %s30_s25 = sshll.u32 %s660_s24, 4  ;;  %s31_s25 = int_to_ptr.vmem [resolvable:$true] %s30_s25 }
   0x4   :  { %s582_s26 = scalar_lea.vmem %s31_s25, 1024  ;;  %p587_p1 = scmp.lt.s32.totalorder %s31_s25, %s31_s25 }
   0x5   :  { %p583_p0 = scmp.ne.s32.totalorder %s31_s25, %s582_s26  ;;  %p588_p2 = scmp.lt.s32.totalorder %s582_s26, %s582_s26 }
   0x7   :  { %p589_p3 = por %p588_p2, %p587_p1 }
   0x9   :  { %p590_p4 = pnand %p589_p3, %p583_p0 }
   0xb   :  { %593 = shalt.err (!%p590_p4)
}
   0xc   :  { %s661_s27 = smov 64   ;;  %s662_s28 = smov 4  }
   0xd   :  { %36 = dma.hbm_to_vmem [thread:$0]  %s772_s1, 1024, %s31_s25, [#allocation5], %s661_s27, %s661_s27, %s662_s28  }
   0xe   :  { %s663_s8 = smov [#allocation2]   ;;  %s664_s10 = smov [#allocation6]  }
   0xf   :  { %s21_s9 = sshll.u32 %s663_s8, 4  ;;  %s44_s11 = sshll.u32 %s664_s10, 4  ;;  %s22_s9 = int_to_ptr.vmem [resolvable:$true] %s21_s9  ;;  %s45_s11 = int_to_ptr.vmem [resolvable:$true] %s44_s11 }
  0x10   :  { %s602_s12 = scalar_lea.vmem %s22_s9, 64  ;;  %p607_p6 = scmp.lt.s32.totalorder %s22_s9, %s22_s9 }
  0x11   :  { %p603_p5 = scmp.ne.s32.totalorder %s22_s9, %s602_s12  ;;  %p608_p7 = scmp.lt.s32.totalorder %s602_s12, %s602_s12 }
  0x13   :  { %p609_p8 = por %p608_p7, %p607_p6 }
  0x15   :  { %p610_p9 = pnand %p609_p8, %p603_p5 }
  0x17   :  { %613 = shalt.err (!%p610_p9)
}
  0x18   :  { %24 = dma.hbm_to_vmem [thread:$0]  %s771_s0, 64, %s22_s9, [#allocation3]  }
  0x19   :  { %s622_s15 = scalar_lea.vmem %s45_s11, 1024  ;;  %p627_p11 = scmp.lt.s32.totalorder %s45_s11, %s45_s11 }
  0x1a   :  { %p623_p10 = scmp.ne.s32.totalorder %s45_s11, %s622_s15  ;;  %p628_p12 = scmp.lt.s32.totalorder %s622_s15, %s622_s15 }
  0x1c   :  { %p629_p13 = por %p628_p12, %p627_p11 }
  0x1e   :  { %p630_p0 = pnand %p629_p13, %p623_p10 }
  0x20   :  { %633 = shalt.err (!%p630_p0)
}
  0x21   :  { %50 = dma.hbm_to_vmem [thread:$0]  %s774_s3, 1024, %s45_s11, [#allocation5], %s661_s27, %s661_s27, %s662_s28  }
  0x22   :  { %s665_s17 = smov [#allocation7]  }
  0x23   :  { %s58_s18 = sshll.u32 %s665_s17, 4  ;;  %s59_s18 = int_to_ptr.vmem [resolvable:$true] %s58_s18 }
  0x24   :  { %s642_s19 = scalar_lea.vmem %s59_s18, 1024  ;;  %p647_p2 = scmp.lt.s32.totalorder %s59_s18, %s59_s18 }
  0x25   :  { %p643_p1 = scmp.ne.s32.totalorder %s59_s18, %s642_s19  ;;  %p648_p3 = scmp.lt.s32.totalorder %s642_s19, %s642_s19 }
  0x27   :  { %p649_p4 = por %p648_p3, %p647_p2 }
  0x29   :  { %p650_p5 = pnand %p649_p4, %p643_p1 }
  0x2b   :  { %653 = shalt.err (!%p650_p5)
}
  0x2c   :  { %64 = dma.hbm_to_vmem [thread:$0]  %s776_s5, 1024, %s59_s18, [#allocation8], %s661_s27, %s661_s27, %s662_s28  }
  0x2d   :  { %654 = dma.done.wait [#allocation3], 64  }
  0x2e   :  { %655 = vsyncadd [#allocation3], 4294967232 }
  0x2f   :  { %656 = dma.done.wait [#allocation5], 2048  }
  0x30   :  { %657 = vsyncadd [#allocation5], 4294965248 }
  0x31   :  { %658 = dma.done.wait [#allocation8], 1024  }
  0x32   :  { %659 = vsyncadd [#allocation8], 4294966272  ;;  %v666_v0 = vmov 0.0   ;;  %vm667_vm0 = vmmov 0   ;;  %v550_v1 = vld [vmem:[#allocation4 + $0x38] sm:$0xff]   ;;  %v551_v2 = vld [vmem:[#allocation4 + $0x30] sm:$0xff]  }
  0x33   :  { %482 = vmatprep.subr.bf16.mxu0 %v666_v0  ;;  %498 = vmatprep.mubr.msk.bf16.mxu0 %vm667_vm0, %v666_v0  ;;  %v552_v3 = vld [vmem:[#allocation4 + $0x28] sm:$0xff]   ;;  %v558_v4 = vld [vmem:[#allocation6 + $0x38] sm:$0xff]   ;;  %v553_v5 = vld [vmem:[#allocation4 + $0x20] sm:$0xff]   ;;  %vm419_vm1 = vcmask 7168  }
  0x34   :  { %502 = vmatprep.subr.bf16.mxu1 %v666_v0  ;;  %518 = vmatprep.mubr.msk.bf16.mxu1 %vm667_vm0, %v666_v0  ;;  %v559_v6 = vld [vmem:[#allocation6 + $0x30] sm:$0xff]   ;;  %v554_v7 = vld [vmem:[#allocation4 + $0x18] sm:$0xff]   ;;  %v560_v8 = vld [vmem:[#allocation6 + $0x28] sm:$0xff]  }
  0x35   :  { %483 = vmatpush3.bf16.msra.mxu0 %v550_v1  ;;  %503 = vmatpush3.bf16.msra.mxu1 %v558_v4  ;;  %v555_v9 = vld [vmem:[#allocation4 + $0x10] sm:$0xff]   ;;  %v561_v10 = vld [vmem:[#allocation6 + $0x20] sm:$0xff]   ;;  %v556_v11 = vld [vmem:[#allocation4 + $0x8] sm:$0xff]  }
  0x36   :  { %484 = vmatprep.subr.bf16.mxu0 %v666_v0  ;;  %504 = vmatprep.subr.bf16.mxu1 %v666_v0  ;;  %v562_v12 = vld [vmem:[#allocation6 + $0x18] sm:$0xff]   ;;  %v557_v13 = vld [vmem:[#allocation4] sm:$0xff]   ;;  %v563_v14 = vld [vmem:[#allocation6 + $0x10] sm:$0xff]  }
  0x37   :  { %v80_v15 = vld [vmem:[#allocation2] sm:$0xf]  ;;  %v564_v16 = vld [vmem:[#allocation6 + $0x8] sm:$0xff]   ;;  %v565_v17 = vld [vmem:[#allocation6] sm:$0xff]  }
  0x38   :  { %v566_v18 = vld [vmem:[#allocation7 + $0x38] sm:$0xff]   ;;  %v567_v19 = vld [vmem:[#allocation7 + $0x30] sm:$0xff]   ;;  %v568_v20 = vld [vmem:[#allocation7 + $0x28] sm:$0xff]  }
  0x39   :  { %485 = vmatpush3.bf16.msra.mxu0 %v551_v2  ;;  %505 = vmatpush3.bf16.msra.mxu1 %v559_v6  ;;  %v569_v21 = vld [vmem:[#allocation7 + $0x20] sm:$0xff]   ;;  %v570_v22 = vld [vmem:[#allocation7 + $0x18] sm:$0xff]   ;;  %v571_v23 = vld [vmem:[#allocation7 + $0x10] sm:$0xff]  }
  0x3a   :  { %486 = vmatprep.subr.bf16.mxu0 %v666_v0  ;;  %506 = vmatprep.subr.bf16.mxu1 %v666_v0  ;;  %v428_v24 = vld [vmem:[%s773_s2] ss:$0 sm:$0xff]  ;;  %v572_v32 = vld [vmem:[#allocation7 + $0x8] sm:$0xff]   ;;  %v573_v33 = vld [vmem:[#allocation7] sm:$0xff]  }
  0x3b   :  { %v437_v34 = vld [vmem:[%s775_s4] ss:$0 sm:$0xff] }
  0x3c   :  { %v446_v42 = vld [vmem:[%s777_s6] ss:$0 sm:$0xff] }
  0x3d   :  { %487 = vmatpush3.bf16.msra.mxu0 %v552_v3  ;;  %507 = vmatpush3.bf16.msra.mxu1 %v560_v8 }
  0x3e   :  { %488 = vmatprep.subr.bf16.mxu0 %v666_v0  ;;  %508 = vmatprep.subr.bf16.mxu1 %v666_v0 }
  0x41   :  { %489 = vmatpush3.bf16.msra.mxu0 %v553_v5  ;;  %509 = vmatpush3.bf16.msra.mxu1 %v561_v10 }
  0x42   :  { %490 = vmatprep.subr.bf16.mxu0 %v666_v0  ;;  %510 = vmatprep.subr.bf16.mxu1 %v666_v0 }
  0x45   :  { %491 = vmatpush3.bf16.msra.mxu0 %v554_v7  ;;  %511 = vmatpush3.bf16.msra.mxu1 %v562_v12 }
  0x46   :  { %492 = vmatprep.subr.bf16.mxu0 %v666_v0  ;;  %512 = vmatprep.subr.bf16.mxu1 %v666_v0 }
  0x49   :  { %493 = vmatpush3.bf16.msra.mxu0 %v555_v9  ;;  %513 = vmatpush3.bf16.msra.mxu1 %v563_v14 }
  0x4a   :  { %494 = vmatprep.subr.bf16.mxu0 %v666_v0  ;;  %514 = vmatprep.subr.bf16.mxu1 %v666_v0 }
  0x4d   :  { %495 = vmatpush3.bf16.msra.mxu0 %v556_v11  ;;  %515 = vmatpush3.bf16.msra.mxu1 %v564_v16 }
  0x4e   :  { %496 = vmatprep.subr.bf16.mxu0 %v666_v0  ;;  %516 = vmatprep.subr.bf16.mxu1 %v666_v0 }
  0x51   :  { %497 = vmatpush3.bf16.msra.mxu0 %v557_v13  ;;  %517 = vmatpush3.bf16.msra.mxu1 %v565_v17 }
  0x52   :  { %522 = vmatprep.subr.bf16.mxu0 %v666_v0 }
  0x54   :  { %499 = vmatmul.mubr.bf16.vlgmr.msra.gmra.mxu0 %v80_v15 }
  0x55   :  { %538 = vmatprep.mubr.msk.bf16.mxu0 %vm667_vm0, %v666_v0  ;;  %523 = vmatpush3.bf16.msra.mxu0 %v566_v18 }
  0x56   :  { %524 = vmatprep.subr.bf16.mxu0 %v666_v0 }
  0x59   :  { %525 = vmatpush3.bf16.msra.mxu0 %v567_v19 }
  0x5a   :  { %526 = vmatprep.subr.bf16.mxu0 %v666_v0 }
  0x5d   :  { %527 = vmatpush3.bf16.msra.mxu0 %v568_v20 }
  0x5e   :  { %528 = vmatprep.subr.bf16.mxu0 %v666_v0 }
  0x61   :  { %529 = vmatpush3.bf16.msra.mxu0 %v569_v21 }
  0x62   :  { %530 = vmatprep.subr.bf16.mxu0 %v666_v0 }
  0x65   :  { %531 = vmatpush3.bf16.msra.mxu0 %v570_v22 }
  0x66   :  { %532 = vmatprep.subr.bf16.mxu0 %v666_v0 }
  0x69   :  { %533 = vmatpush3.bf16.msra.mxu0 %v571_v23 }
  0x6a   :  { %534 = vmatprep.subr.bf16.mxu0 %v666_v0 }
  0x6d   :  { %535 = vmatpush3.bf16.msra.mxu0 %v572_v32 }
  0x6e   :  { %536 = vmatprep.subr.bf16.mxu0 %v666_v0 }
  0x71   :  { %537 = vmatpush3.bf16.msra.mxu0 %v573_v33 }
 0x114   :  { %v186_v25 = vpop.f32.mrf.mxu0 }
 0x115   :  { %v187_v26 = vadd.f32 %v428_v24, %v186_v25 }
 0x116   :  { %v500_v27 = vpop.f32.mrf.mxu0 }
 0x117   :  { %v192_v28 = vmax.f32 %v187_v26, 0.0 }
 0x118   :  { %v189_v29 = vpop.f32.mrf.mxu0 }
 0x119   :  { %v193_v30 = vpack.c.bf16 %v192_v28, %v192_v28 }
 0x11a   :  { %v501_v31 = vpop.f32.mrf.mxu0 }
 0x11b   :  { %519 = vmatmul.mubr.bf16.vlgmr.msra.gmra.mxu1 %v193_v30 }
 0x1db   :  { %v299_v35 = vpop.f32.mrf.mxu1 }
 0x1dc   :  { %v300_v36 = vadd.f32 %v437_v34, %v299_v35 }
 0x1dd   :  { %v520_v37 = vpop.f32.mrf.mxu1 }
 0x1de   :  { %v305_v38 = vmax.f32 %v300_v36, 0.0 }
 0x1df   :  { %v302_v39 = vpop.f32.mrf.mxu1 }
 0x1e0   :  { %v306_v40 = vpack.c.bf16 %v305_v38, %v305_v38 }
 0x1e1   :  { %v521_v41 = vpop.f32.mrf.mxu1 }
 0x1e2   :  { %539 = vmatmul.mubr.bf16.vlgmr.msra.gmra.mxu0 %v306_v40 }
 0x2a2   :  { %v412_v43 = vpop.f32.mrf.mxu0 }
 0x2a3   :  { %v413_v44 = vadd.f32 %v446_v42, %v412_v43 }
 0x2a4   :  { %v540_v45 = vpop.f32.mrf.mxu0 }
 0x2a5   :  { %v418_v46 = vmax.f32 %v413_v44, 0.0 }
 0x2a6   :  { %v415_v47 = vpop.f32.mrf.mxu0 }
 0x2a7   :  { %420 = vst.msk [vmem:[%s778_s7] sm:$0xff] %vm419_vm1, %v418_v46 }
 0x2a8   :  { %v541_v48 = vpop.f32.mrf.mxu0 }
 0x2a9   :  { %425 = vsyncpa [#allocation3], 1 }
 0x2aa   :  { %426 = vsyncpa [#allocation5], 1 }
 0x2ab   :  { %427 = vsyncpa [#allocation8], 1 }

</bundles_post_ra>
